<compile_context>
chip_gen: v6e
topology: v6e:2x2x1
jax: 0.10.0
libtpu: 0.0.40
codegen_flags: <defaults>
</compile_context>

<pallas_src>
import jax
import jax.numpy as jnp
import numpy as np
from jax.experimental import pallas as pl
from jax.experimental.pallas import tpu as pltpu

N = 64       # n_cells
C_IN = 8     # in_channels
C_OUT = 16   # out_channels
J = 2        # num_filters_J (p_filters)

_U_COL = (J + 1) * C_OUT          # column of the fused weight slab holding [u_down ; u_up]
_V_COL = _U_COL + 1               # columns [_V_COL, _V_COL+C_IN): rows 0/1 hold v_down / v_up


def san_layer_kernel(x_ref, nbp_ref, w_ref, out_ref):
    f32 = jnp.float32

    x = x_ref[...]                                                      # (N, C_IN)
    w = w_ref[...]                                                      # (2*C_IN, 64)

    # --- single fused block projection: rows [0,N) use the "down" weights, [N,2N) the "up" ones.
    #     xcat[:, 16k:16(k+1)]  = stacked xm_k = [x@Wd_k ; x@Wu_k]
    #     xcat[:, 32:48]        = [x@Wh ; 0]
    #     xcat[:, 48]           = [x@u_down ; x@u_up]   (attention target scores)
    xcat = jnp.concatenate(
        [jnp.dot(x, w[:C_IN, :], preferred_element_type=f32),
         jnp.dot(x, w[C_IN:, :], preferred_element_type=f32)], axis=0)  # (2N, 64)

    # --- attention logits on the block-diagonal (2N, 2N) slab
    s_tgt = xcat[:, _U_COL:_U_COL + 1]                                  # (2N, 1)
    v_mat = w[0:2, _V_COL:_V_COL + C_IN]                                # (2, C_IN) = [v_down ; v_up]
    # NT dot_general (contract channel dims) -> no in-kernel transpose of x needed.
    s2 = jax.lax.dot_general(v_mat, x, (((1,), (1,)), ((), ())),
                             preferred_element_type=f32)                # (2, N) source scores
    s_src = jnp.concatenate([s2[0:1, :], s2[1:2, :]], axis=1)           # (1, 2N)
    e = s_tgt + s_src                                                   # (2N, 2N) broadcast
    e = jnp.where(e > 0, e, jnp.exp(jnp.minimum(e, 0.0)) - 1.0)         # ELU (min guards overflow)

    # --- masked (sparse) row softmax for both branches in one pass over the 128x128 slab.
    # TODO(synk): torch.sparse.softmax keeps explicitly-stored zero values in the support; the dense
    # emulation (entry != 0) treats them as absent, matching the dense reference used here.
    nb = nbp_ref[0:2 * N, :]                                            # (2N, 2N) blockdiag(Ldown, Lup)
    mask = nb != 0.0
    neg = jnp.float32(-1e30)                                            # f32 sentinel (softmax stays f32)
    e_m = jnp.where(mask, e, neg)
    row_max = jnp.max(e_m, axis=1, keepdims=True)
    row_max = jnp.where(row_max > neg * 0.5, row_max, 0.0)
    p = jnp.where(mask, jnp.exp(e_m - row_max), 0.0)
    denom = jnp.sum(p, axis=1, keepdims=True)
    att = p / jnp.where(denom > 0.0, denom, 1.0)                        # (2N, 2N), block-diagonal

    # --- Horner for both branches at once:  sum_k A^(k+1) @ xm_k = A @ (xm_0 + A @ (xm_1 + ...))
    acc = xcat[:, (J - 1) * C_OUT:J * C_OUT]                            # (2N, C_OUT)
    for k in range(J - 2, -1, -1):
        acc = xcat[:, k * C_OUT:(k + 1) * C_OUT] + \
              jnp.dot(att, acc, preferred_element_type=f32)

    # --- fused final contraction:
    #     out = [A_down | A_up | P | 0] (N, 4N)  @  [acc_down ; acc_up ; x@Wh ; 0] (4N, C_OUT)
    #         = z_down + z_up + P @ (x @ Wh)
    xm_h = xcat[:, J * C_OUT:(J + 1) * C_OUT]                           # (2N, C_OUT), bottom half 0
    s_lhs = att[:N, :] + att[N:, :]                                     # (N, 2N) = [A_down | A_up]
    lhs = jnp.concatenate([s_lhs, nbp_ref[2 * N:3 * N, :]], axis=1)     # (N, 4N) = (64, 256)
    rhs = jnp.concatenate([acc, xm_h], axis=0)                          # (4N, C_OUT) = (256, 16)
    out_ref[...] = jnp.dot(lhs, rhs, preferred_element_type=f32)        # (N, C_OUT)


# --------------------- one-time packing (hoisted; pure numpy, zero XLA dispatches) ---------------------
def pack_params(params):
    """Fold all SANLayer parameters into one lane-dense (2*C_IN, 64) f32 slab."""
    wd = np.asarray(params["w_down"], np.float64)
    ad = np.asarray(params["a_down"], np.float64)
    wu = np.asarray(params["w_up"], np.float64)
    au = np.asarray(params["a_up"], np.float64)
    wh = np.asarray(params["w_har"], np.float64)
    F = J * C_OUT

    def att_vectors(w, a):
        # attention value per edge (i<-j) = elu( concat(x_msg[j], x_msg[i]) . att_weight )
        # being linear in x_msg, it decomposes into per-node scalars x@v (source) and x@u (target).
        a_src, a_tgt = a[:F], a[F:]
        u = sum(w[k] @ a_tgt[k * C_OUT:(k + 1) * C_OUT] for k in range(J))
        v = sum(w[k] @ a_src[k * C_OUT:(k + 1) * C_OUT] for k in range(J))
        return u, v

    ud, vd = att_vectors(wd, ad)
    uu, vu = att_vectors(wu, au)

    slab = np.zeros((2 * C_IN, 64), np.float64)
    for k in range(J):
        slab[:C_IN, k * C_OUT:(k + 1) * C_OUT] = wd[k]
        slab[C_IN:, k * C_OUT:(k + 1) * C_OUT] = wu[k]
    slab[:C_IN, J * C_OUT:(J + 1) * C_OUT] = wh
    slab[:C_IN, _U_COL] = ud
    slab[C_IN:, _U_COL] = uu
    slab[0, _V_COL:_V_COL + C_IN] = vd
    slab[1, _V_COL:_V_COL + C_IN] = vu
    return jnp.asarray(slab.astype(np.float32))


def pack_structure(Lup, Ldown, P):
    """Pack blockdiag(Ldown, Lup) and [P | 0] into one (3N, 2N) f32 slab (done once per complex)."""
    slab = np.zeros((3 * N, 2 * N), np.float32)
    slab[:N, :N] = np.asarray(Ldown, np.float32)
    slab[N:2 * N, N:] = np.asarray(Lup, np.float32)
    slab[2 * N:, :N] = np.asarray(P, np.float32)
    return jnp.asarray(slab)


# ------------------------------------ per-call path: one pallas_call ------------------------------------
_vmem = pl.BlockSpec(memory_space=pltpu.MemorySpace.VMEM)
_san_call = jax.jit(pl.pallas_call(
    san_layer_kernel,
    out_shape=jax.ShapeDtypeStruct((N, C_OUT), jnp.float32),
    in_specs=[_vmem, _vmem, _vmem],
    out_specs=_vmem,
))


def san_layer(x, nbp_slab, w_pack):
    """Per-call path: exactly one pallas_call, no host-side preprocessing."""
    return _san_call(x, nbp_slab, w_pack)


# ----------------------- pure-JAX reference (mirrors the torch code, f32, highest precision) -----------------------
_HI = jax.lax.Precision.HIGHEST


def _san_conv_ref(x, nbhd, w, a):
    F = J * C_OUT
    xm = jnp.einsum("ni,pio->pno", x, w, precision=_HI)            # (J, N, C_OUT)
    x_r = jnp.transpose(xm, (1, 0, 2)).reshape(N, F)               # (N, J*C_OUT)
    s_src = jnp.dot(x_r, a[:F], precision=_HI)                     # (N,)
    s_tgt = jnp.dot(x_r, a[F:], precision=_HI)                     # (N,)
    e_lin = s_tgt[:, None] + s_src[None, :]                        # e[i,j] = cat(xr[j], xr[i]) . a
    e = jnp.where(e_lin > 0, e_lin, jnp.exp(jnp.minimum(e_lin, 0.0)) - 1.0)   # ELU
    mask = nbhd != 0.0
    e_m = jnp.where(mask, e, -jnp.inf)
    row_max = jnp.max(e_m, axis=1, keepdims=True)
    row_max = jnp.where(jnp.isfinite(row_max), row_max, 0.0)
    p = jnp.where(mask, jnp.exp(e - row_max), 0.0)
    denom = jnp.sum(p, axis=1, keepdims=True)
    att = jnp.where(denom > 0, p / jnp.where(denom > 0, denom, 1.0), 0.0)
    a_pow = att                                                    # explicit powers (checks Horner)
    res = jnp.dot(a_pow, xm[0], precision=_HI)
    for k in range(1, J):
        a_pow = jnp.dot(a_pow, att, precision=_HI)
        res = res + jnp.dot(a_pow, xm[k], precision=_HI)
    return res


def san_layer_ref(x, Lup, Ldown, P, params):
    z_down = _san_conv_ref(x, Ldown, params["w_down"], params["a_down"])
    z_up = _san_conv_ref(x, Lup, params["w_up"], params["a_up"])
    z_har = jnp.dot(P, jnp.dot(x, params["w_har"], precision=_HI), precision=_HI)
    return z_down + z_up + z_har


# ----------------------------------------- main -----------------------------------------
def _xavier(key, shape, gain=1.414):
    fan_in, fan_out = shape[-2], shape[-1]
    bound = gain * np.sqrt(6.0 / (fan_in + fan_out))
    return jax.random.uniform(key, shape, jnp.float32, -bound, bound)


def _make_nbhd(key):
    k1, k2 = jax.random.split(key)
    pattern = jax.random.uniform(k1, (N, N)) < 0.15
    vals = jax.random.normal(k2, (N, N), jnp.float32)
    m = jnp.where(pattern, vals, 0.0)
    # ones on the diagonal so every row has at least one stored entry
    m = jnp.where(jnp.eye(N, dtype=bool), 1.0, m)
    return m.astype(jnp.float32)


if __name__ == "__main__":
    key = jax.random.PRNGKey(0)
    ks = jax.random.split(key, 10)

    params = {
        "w_down": _xavier(ks[0], (J, C_IN, C_OUT)),
        "a_down": jax.random.uniform(ks[1], (2 * J * C_OUT,), jnp.float32, -0.3, 0.3),
        "w_up":   _xavier(ks[2], (J, C_IN, C_OUT)),
        "a_up":   jax.random.uniform(ks[3], (2 * J * C_OUT,), jnp.float32, -0.3, 0.3),
        "w_har":  _xavier(ks[4], (C_IN, C_OUT)),
    }

    x = jax.random.normal(ks[5], (N, C_IN), jnp.float32)
    Ldown = _make_nbhd(ks[6])
    Lup = _make_nbhd(ks[7])
    P = _make_nbhd(ks[8])

    # One-time packing (outside the per-call path).
    w_pack = pack_params(params)
    nbp_slab = pack_structure(Lup, Ldown, P)

    out = jax.block_until_ready(san_layer(x, nbp_slab, w_pack))
    ref = jax.block_until_ready(san_layer_ref(x, Lup, Ldown, P, params))

    # All matmul operands are f32 now (no bf16 casts), so the tolerance is tight again.
    np.testing.assert_allclose(np.asarray(out), np.asarray(ref), rtol=1e-3, atol=1e-3)

    print("KERNEL_OK")
</pallas_src>

<mosaic_0001>
module attributes {stable_mosaic.version = 11 : i64} {
  func.func @san_layer_kernel(%arg0: memref<64x8xf32, #tpu.memory_space<vmem>>, %arg1: memref<192x128xf32, #tpu.memory_space<vmem>>, %arg2: memref<16x64xf32, #tpu.memory_space<vmem>>, %arg3: memref<64x16xf32, #tpu.memory_space<vmem>>) attributes {dimension_semantics = [], scalar_prefetch = 0 : i64, scratch_operands = 0 : i64, tpu.core_type = #tpu.core_type<tc>} {
    %c0 = arith.constant 0 : index
    %c0_0 = arith.constant 0 : index
    %0 = vector.load %arg0[%c0, %c0_0] : memref<64x8xf32, #tpu.memory_space<vmem>>, vector<64x8xf32>
    %c0_1 = arith.constant 0 : index
    %c0_2 = arith.constant 0 : index
    %1 = vector.load %arg2[%c0_1, %c0_2] : memref<16x64xf32, #tpu.memory_space<vmem>>, vector<16x64xf32>
    %2 = vector.extract_strided_slice %1 {offsets = [0, 0], sizes = [8, 64], strides = [1, 1]} : vector<16x64xf32> to vector<8x64xf32>
    %cst = arith.constant dense<0.000000e+00> : vector<64x64xf32>
    %3 = tpu.matmul %0, %2, %cst {dimension_numbers = #tpu.dot_dimension_numbers<[1], [0], [0], [1], [0, 0, 1, 1], [], []>} : vector<64x8xf32>, vector<8x64xf32>, vector<64x64xf32> -> vector<64x64xf32>
    %4 = vector.extract_strided_slice %1 {offsets = [8, 0], sizes = [8, 64], strides = [1, 1]} : vector<16x64xf32> to vector<8x64xf32>
    %cst_3 = arith.constant dense<0.000000e+00> : vector<64x64xf32>
    %5 = tpu.matmul %0, %4, %cst_3 {dimension_numbers = #tpu.dot_dimension_numbers<[1], [0], [0], [1], [0, 0, 1, 1], [], []>} : vector<64x8xf32>, vector<8x64xf32>, vector<64x64xf32> -> vector<64x64xf32>
    %6 = tpu.concatenate %3, %5 in 0 : vector<64x64xf32>, vector<64x64xf32> -> vector<128x64xf32>
    %7 = vector.extract_strided_slice %6 {offsets = [0, 48], sizes = [128, 1], strides = [1, 1]} : vector<128x64xf32> to vector<128x1xf32>
    %8 = vector.extract_strided_slice %1 {offsets = [0, 49], sizes = [2, 8], strides = [1, 1]} : vector<16x64xf32> to vector<2x8xf32>
    %cst_4 = arith.constant dense<0.000000e+00> : vector<2x64xf32>
    %9 = tpu.matmul %8, %0, %cst_4 {dimension_numbers = #tpu.dot_dimension_numbers<[1], [1], [0], [0], [0, 0, 1, 0], [], []>} : vector<2x8xf32>, vector<64x8xf32>, vector<2x64xf32> -> vector<2x64xf32>
    %10 = vector.extract_strided_slice %9 {offsets = [0, 0], sizes = [1, 64], strides = [1, 1]} : vector<2x64xf32> to vector<1x64xf32>
    %11 = vector.extract_strided_slice %9 {offsets = [1, 0], sizes = [1, 64], strides = [1, 1]} : vector<2x64xf32> to vector<1x64xf32>
    %12 = tpu.concatenate %10, %11 in 1 : vector<1x64xf32>, vector<1x64xf32> -> vector<1x128xf32>
    %13 = vector.broadcast %7 : vector<128x1xf32> to vector<128x128xf32>
    %14 = vector.broadcast %12 : vector<1x128xf32> to vector<128x128xf32>
    %15 = arith.addf %13, %14 : vector<128x128xf32>
    %cst_5 = arith.constant 0.000000e+00 : f32
    %16 = vector.broadcast %cst_5 : f32 to vector<128x128xf32>
    %17 = arith.cmpf ogt, %15, %16 : vector<128x128xf32>
    %cst_6 = arith.constant 0.000000e+00 : f32
    %18 = vector.broadcast %cst_6 : f32 to vector<128x128xf32>
    %19 = arith.minimumf %15, %18 : vector<128x128xf32>
    %20 = math.exp %19 : vector<128x128xf32>
    %cst_7 = arith.constant 1.000000e+00 : f32
    %21 = vector.broadcast %cst_7 : f32 to vector<128x128xf32>
    %22 = arith.subf %20, %21 : vector<128x128xf32>
    %23 = arith.select %17, %15, %22 : vector<128x128xi1>, vector<128x128xf32>
    %c0_8 = arith.constant 0 : index
    %c0_9 = arith.constant 0 : index
    %24 = vector.load %arg1[%c0_8, %c0_9] : memref<192x128xf32, #tpu.memory_space<vmem>>, vector<128x128xf32>
    %cst_10 = arith.constant 0.000000e+00 : f32
    %25 = vector.broadcast %cst_10 : f32 to vector<128x128xf32>
    %26 = arith.cmpf one, %24, %25 : vector<128x128xf32>
    %cst_11 = arith.constant -1.000000e+30 : f32
    %27 = vector.broadcast %cst_11 : f32 to vector<128x128xf32>
    %28 = arith.select %26, %23, %27 : vector<128x128xi1>, vector<128x128xf32>
    %cst_12 = arith.constant dense<0xFF800000> : vector<128xf32>
    %29 = vector.multi_reduction <maximumf>, %28, %cst_12 [1] : vector<128x128xf32> to vector<128xf32>
    %30 = vector.shape_cast %29 : vector<128xf32> to vector<128x1xf32>
    %cst_13 = arith.constant -1.000000e+30 : f32
    %cst_14 = arith.constant 5.000000e-01 : f32
    %31 = arith.mulf %cst_13, %cst_14 : f32
    %32 = vector.broadcast %31 : f32 to vector<128x1xf32>
    %33 = arith.cmpf ogt, %30, %32 : vector<128x1xf32>
    %cst_15 = arith.constant 0.000000e+00 : f32
    %34 = vector.broadcast %cst_15 : f32 to vector<128x1xf32>
    %35 = arith.select %33, %30, %34 : vector<128x1xi1>, vector<128x1xf32>
    %36 = vector.broadcast %35 : vector<128x1xf32> to vector<128x128xf32>
    %37 = arith.subf %28, %36 : vector<128x128xf32>
    %38 = math.exp %37 : vector<128x128xf32>
    %cst_16 = arith.constant 0.000000e+00 : f32
    %39 = vector.broadcast %cst_16 : f32 to vector<128x128xf32>
    %40 = arith.select %26, %38, %39 : vector<128x128xi1>, vector<128x128xf32>
    %cst_17 = arith.constant dense<0.000000e+00> : vector<128xf32>
    %41 = vector.multi_reduction <add>, %40, %cst_17 [1] : vector<128x128xf32> to vector<128xf32>
    %42 = vector.shape_cast %41 : vector<128xf32> to vector<128x1xf32>
    %cst_18 = arith.constant 0.000000e+00 : f32
    %43 = vector.broadcast %cst_18 : f32 to vector<128x1xf32>
    %44 = arith.cmpf ogt, %42, %43 : vector<128x1xf32>
    %cst_19 = arith.constant 1.000000e+00 : f32
    %45 = vector.broadcast %cst_19 : f32 to vector<128x1xf32>
    %46 = arith.select %44, %42, %45 : vector<128x1xi1>, vector<128x1xf32>
    %47 = vector.broadcast %46 : vector<128x1xf32> to vector<128x128xf32>
    %48 = arith.divf %40, %47 : vector<128x128xf32>
    %49 = vector.extract_strided_slice %6 {offsets = [0, 16], sizes = [128, 16], strides = [1, 1]} : vector<128x64xf32> to vector<128x16xf32>
    %50 = vector.extract_strided_slice %6 {offsets = [0, 0], sizes = [128, 16], strides = [1, 1]} : vector<128x64xf32> to vector<128x16xf32>
    %cst_20 = arith.constant dense<0.000000e+00> : vector<128x16xf32>
    %51 = tpu.matmul %48, %49, %cst_20 {dimension_numbers = #tpu.dot_dimension_numbers<[1], [0], [0], [1], [0, 0, 1, 1], [], []>} : vector<128x128xf32>, vector<128x16xf32>, vector<128x16xf32> -> vector<128x16xf32>
    %52 = arith.addf %50, %51 : vector<128x16xf32>
    %53 = vector.extract_strided_slice %6 {offsets = [0, 32], sizes = [128, 16], strides = [1, 1]} : vector<128x64xf32> to vector<128x16xf32>
    %54 = vector.extract_strided_slice %48 {offsets = [0, 0], sizes = [64, 128], strides = [1, 1]} : vector<128x128xf32> to vector<64x128xf32>
    %55 = vector.extract_strided_slice %48 {offsets = [64, 0], sizes = [64, 128], strides = [1, 1]} : vector<128x128xf32> to vector<64x128xf32>
    %56 = arith.addf %54, %55 : vector<64x128xf32>
    %c128 = arith.constant 128 : index
    %c0_21 = arith.constant 0 : index
    %57 = vector.load %arg1[%c128, %c0_21] : memref<192x128xf32, #tpu.memory_space<vmem>>, vector<64x128xf32>
    %58 = tpu.concatenate %56, %57 in 1 : vector<64x128xf32>, vector<64x128xf32> -> vector<64x256xf32>
    %59 = tpu.concatenate %52, %53 in 0 : vector<128x16xf32>, vector<128x16xf32> -> vector<256x16xf32>
    %cst_22 = arith.constant dense<0.000000e+00> : vector<64x16xf32>
    %60 = tpu.matmul %58, %59, %cst_22 {dimension_numbers = #tpu.dot_dimension_numbers<[1], [0], [0], [1], [0, 0, 1, 1], [], []>} : vector<64x256xf32>, vector<256x16xf32>, vector<64x16xf32> -> vector<64x16xf32>
    %c0_23 = arith.constant 0 : index
    %c0_24 = arith.constant 0 : index
    %61 = vector.load %arg3[%c0_23, %c0_24] : memref<64x16xf32, #tpu.memory_space<vmem>>, vector<64x16xf32>
    tpu.vector_store %arg3[%c0_23, %c0_24], %60 {strides = array<i32>} : memref<64x16xf32, #tpu.memory_space<vmem>>, vector<64x16xf32>,
    return
  }
}

</mosaic_0001>

<bundles_post_ra>
// kernel: tpu_custom_call.1
= control target key start
LH: loop header
LB: loop body
LE: loop exit
PB: predicated region body
PF: predicated region fallthrough
CT: control target
= control target key end

     0   :  { %8 = vsyncpa [#allocation3], 0  ;;  %s1636_s12 = smov [#allocation2]   ;;  %s2258_s0 = inlined_call_operand.vmem [shape: f32[64,8], index: 0, kind: input, shape index: {}]   ;;  %s2259_s1 = inlined_call_operand.hbm [shape: f32[192,128], index: 1, kind: input, shape index: {}]   ;;  %s2260_s2 = inlined_call_operand.vmem [shape: f32[16,64], index: 2, kind: input, shape index: {}]   ;;  %s2261_s3 = inlined_call_operand.vmem [shape: f32[64,16], index: 3, kind: output, shape index: {}]  }
   0x1   :  { %s16_s13 = sshll.u32 %s1636_s12, 4  ;;  %s17_s13 = int_to_ptr.vmem [resolvable:$true] %s16_s13 }
   0x2   :  { %s1622_s14 = scalar_lea.vmem %s17_s13, 3072  ;;  %p1627_p1 = scmp.lt.s32.totalorder %s17_s13, %s17_s13 }
   0x3   :  { %p1623_p0 = scmp.ne.s32.totalorder %s17_s13, %s1622_s14  ;;  %p1628_p2 = scmp.lt.s32.totalorder %s1622_s14, %s1622_s14 }
   0x5   :  { %p1629_p3 = por %p1628_p2, %p1627_p1 }
   0x7   :  { %p1630_p4 = pnand %p1629_p3, %p1623_p0 }
   0x9   :  { %1633 = shalt.err (!%p1630_p4)
}
   0xa   :  { %s1637_s15 = smov 128   ;;  %s1638_s16 = smov 8  }
   0xb   :  { %22 = dma.hbm_to_vmem [thread:$0]  %s2259_s1, 3072, %s17_s13, [#allocation3], %s1637_s15, %s1637_s15, %s1638_s16  }
   0xc   :  { %1634 = dma.done.wait [#allocation3], 3072  }
   0xd   :  { %1635 = vsyncadd [#allocation3], 4294964224  ;;  %vm38_vm0 = vcmask 64512   ;;  %v36_v0 = vld [vmem:[%s2260_s2] sm:$0xff]  ;;  %v29_v2 = vld [vmem:[%s2258_s0 + $0x8] sm:$0xff]  ;;  %s1639_s25 = smov 79   ;;  %v435_v41 = vlaneseq }
   0xe   :  { %v28_v1 = vld [vmem:[%s2258_s0] sm:$0xff]  ;;  %274 = vrot.lane.b32.xlu0 %v36_v0, %s1639_s25  ;;  %1371 = vmatprep.subr.mxu0 %v36_v0  ;;  %v30_v3 = vld [vmem:[%s2258_s0 + $0x10] sm:$0xff]  ;;  %v37_v4 = vld [vmem:[%s2260_s2 + $0x8] sm:$0xff]  ;;  %v1640_v8 = vmov 0.0   ;;  %vm1641_vm1 = vmmov 0   ;;  %v1642_v11 = vmov 48  }
   0xf   :  { %1372 = vmatpush3.msra.mxu0 %v36_v0  ;;  %1373 = vmatprep.mubr.msk.f32.mxu0 %vm38_vm0, %v28_v1  ;;  %v31_v5 = vld [vmem:[%s2258_s0 + $0x18] sm:$0xff]  ;;  %v32_v6 = vld [vmem:[%s2258_s0 + $0x20] sm:$0xff]  ;;  %v33_v9 = vld [vmem:[%s2258_s0 + $0x28] sm:$0xff]  ;;  %s1644_s11 = smov 64   ;;  %v436_v42 = vshrl.u32 %v435_v41, 7  ;;  %vm353_vm2 = vcmask 523264  }
  0x10   :  { %1374 = vmatmul.mubr.msk.f32.vlgmr.msra.gmra.mxu0 %vm38_vm0, %v29_v2  ;;  %1387 = vmatprep.mubr.msk.f32.mxu1 %vm38_vm0, %v28_v1  ;;  %v35_v7 = vld [vmem:[%s2258_s0 + $0x38] sm:$0xff]  ;;  %v34_v10 = vld [vmem:[%s2258_s0 + $0x30] sm:$0xff]  ;;  %s1643_s0 = smov 112   ;;  %s1645_s12 = smov 96  }
  0x11   :  { %1376 = vmatprep.mubr.msk.f32.mxu0 %vm38_vm0, %v30_v3  ;;  %1385 = vmatprep.subr.mxu1 %v37_v4  ;;  %v437_v44 = vsub.s32 0, %v436_v42 }
  0x12   :  { %1386 = vmatpush3.msra.mxu1 %v37_v4  ;;  %1399 = vmatprep.subr.mxu0 %v1640_v8 }
  0x13   :  { %1388 = vmatmul.mubr.msk.f32.vlgmr.msra.gmra.mxu1 %vm38_vm0, %v29_v2  ;;  %1400 = vmatpush3.xpose.msk.msra.mxu0 %vm38_vm0, %v35_v7 }
  0x14   :  { %1377 = vmatmul.mubr.msk.f32.gmra.mxu0 %vm38_vm0, %v31_v5  ;;  %1390 = vmatprep.mubr.msk.f32.mxu1 %vm38_vm0, %v30_v3 }
  0x15   :  { %1379 = vmatprep.mubr.msk.f32.mxu0 %vm38_vm0, %v32_v6  ;;  %1401 = vmatprep.subr.mxu0 %v1640_v8 }
  0x16   :  { %1517 = vset.pattern.permute.xlu0 %v1642_v11  ;;  %1516 = vset.pattern.permute.xlu1 %v1642_v11 }
  0x17   :  { %1391 = vmatmul.mubr.msk.f32.gmra.mxu1 %vm38_vm0, %v31_v5  ;;  %1402 = vmatpush3.xpose.msk.msra.mxu0 %vm38_vm0, %v34_v10 }
  0x18   :  { %1380 = vmatmul.mubr.msk.f32.gmra.mxu0 %vm38_vm0, %v33_v9  ;;  %1393 = vmatprep.mubr.msk.f32.mxu1 %vm38_vm0, %v32_v6 }
  0x19   :  { %1382 = vmatprep.mubr.msk.f32.mxu0 %vm38_vm0, %v34_v10  ;;  %1403 = vmatprep.subr.mxu0 %v1640_v8 }
  0x1b   :  { %1394 = vmatmul.mubr.msk.f32.gmra.mxu1 %vm38_vm0, %v33_v9  ;;  %1404 = vmatpush3.xpose.msk.msra.mxu0 %vm38_vm0, %v33_v9 }
  0x1c   :  { %1383 = vmatmul.mubr.msk.f32.gmra.mxu0 %vm38_vm0, %v35_v7  ;;  %1396 = vmatprep.mubr.msk.f32.mxu1 %vm38_vm0, %v34_v10 }
  0x1d   :  { %1405 = vmatprep.subr.mxu0 %v1640_v8  ;;  %1415 = vmatprep.mubr.msk.f32.mxu0 %vm1641_vm1, %v1640_v8 }
  0x1f   :  { %1397 = vmatmul.mubr.msk.f32.gmra.mxu1 %vm38_vm0, %v35_v7  ;;  %1406 = vmatpush3.xpose.msk.msra.mxu0 %vm38_vm0, %v32_v6 }
  0x20   :  { %1407 = vmatprep.subr.mxu0 %v1640_v8 }
  0x23   :  { %1408 = vmatpush3.xpose.msk.msra.mxu0 %vm38_vm0, %v31_v5 }
  0x24   :  { %1409 = vmatprep.subr.mxu0 %v1640_v8 }
  0x27   :  { %1410 = vmatpush3.xpose.msk.msra.mxu0 %vm38_vm0, %v30_v3 }
  0x28   :  { %1411 = vmatprep.subr.mxu0 %v1640_v8 }
  0x2b   :  { %1412 = vmatpush3.xpose.msk.msra.mxu0 %vm38_vm0, %v29_v2 }
  0x2c   :  { %1413 = vmatprep.subr.mxu0 %v1640_v8 }
  0x2f   :  { %1414 = vmatpush3.xpose.msk.msra.mxu0 %vm38_vm0, %v28_v1 }
  0x80   :  { %v275_v12 = vpop.permute.xlu0 %274 }
  0x81   :  { %1416 = vmatmul.mubr.msk.f32.vlgmr.msra.gmra.mxu0 %vm38_vm0, %v275_v12  ;;  %v1833_v12 = vld [vmem:[#allocation2 + $0x8] sm:$0xff] }
  0x82   :  { %vm568_vm4 = vcmp.ne.f32.partialorder %v1833_v12, 0.0 }
  0xd0   :  { %v1724_v13 = vpop.f32.mrf.mxu0 }
  0xd1   :  { %362 = vperm.xlu1 %1516, %v1724_v13  }
  0xd2   :  { %v1727_v14 = vpop.f32.mrf.mxu0 }
  0xd3   :  { %357 = vperm.xlu0 %1517, %v1727_v14   ;;  %v1732_v16 = vpop.f32.mrf.mxu1 }
  0xd4   :  { %v1730_v15 = vpop.f32.mrf.mxu0 }
  0xd5   :  { %v1739_v19 = vpop.f32.mrf.mxu1 }
  0xd6   :  { %v1734_v17 = vpop.f32.mrf.mxu0 }
  0xd7   :  { %372 = vperm.xlu0 %1517, %v1730_v15   ;;  %v1746_v22 = vpop.f32.mrf.mxu1 }
  0xd8   :  { %v1737_v18 = vpop.f32.mrf.mxu0 }
  0xd9   :  { %v1749_v23 = vpop.f32.mrf.mxu1 }
  0xda   :  { %v1741_v20 = vpop.f32.mrf.mxu0 }
  0xdb   :  { %382 = vperm.xlu0 %1517, %v1737_v18   ;;  %v1752_v24 = vpop.f32.mrf.mxu1 }
  0xdc   :  { %v1744_v21 = vpop.f32.mrf.mxu0 }
  0xdd   :  { %v1755_v25 = vpop.f32.mrf.mxu1 }
  0xde   :  { %v1771_v27 = vpop.f32.mrf.mxu0 }
  0xdf   :  { %392 = vperm.xlu0 %1517, %v1744_v21   ;;  %v1758_v26 = vpop.f32.mrf.mxu1 }
  0xe1   :  { %v1781_v36 = vpop.f32.mrf.mxu1 }
  0xe3   :  { %402 = vperm.xlu0 %1517, %v1732_v16  }
  0xe7   :  { %412 = vperm.xlu0 %1517, %v1746_v22  }
  0xeb   :  { %422 = vperm.xlu0 %1517, %v1752_v24  }
  0xef   :  { %432 = vperm.xlu0 %1517, %v1758_v26  }
  0xf3   :  { %853 = vrot.lane.b32.xlu0 %v1758_v26, %s1643_s0 }
  0xf7   :  { %849 = vrot.lane.b32.xlu0 %v1752_v24, %s1643_s0 }
  0xfb   :  { %847 = vrot.lane.b32.xlu0 %v1755_v25, %s1643_s0 }
  0xff   :  { %843 = vrot.lane.b32.xlu0 %v1749_v23, %s1643_s0 }
 0x103   :  { %839 = vrot.lane.b32.xlu0 %v1739_v19, %s1643_s0 }
 0x107   :  { %835 = vrot.lane.b32.xlu0 %v1771_v27, %s1643_s0 }
 0x141   :  { %v344_v28 = vpop.f32.mrf.mxu0 }
 0x142   :  { %v349_v29 = vrot.slane %v344_v28, 1 }
 0x143   :  { %v1417_v30 = vpop.f32.mrf.mxu0 }
 0x144   :  { %350 = vrot.lane.b32.xlu1 %v349_v29, %s1644_s11 }
 0x148   :  { %367 = vperm.xlu1 %1516, %v1734_v17  }
 0x14c   :  { %377 = vperm.xlu1 %1516, %v1741_v20   ;;  %v363_v43 = vpop.permute.xlu1 %362 }
 0x14e   :  { %v358_v31 = vpop.permute.xlu0 %357 }
 0x150   :  { %387 = vperm.xlu1 %1516, %v1771_v27  }
 0x152   :  { %v373_v32 = vpop.permute.xlu0 %372 }
 0x154   :  { %397 = vperm.xlu1 %1516, %v1739_v19  }
 0x156   :  { %v383_v33 = vpop.permute.xlu0 %382 }
 0x158   :  { %407 = vperm.xlu1 %1516, %v1749_v23  }
 0x15a   :  { %v393_v34 = vpop.permute.xlu0 %392 }
 0x15c   :  { %417 = vperm.xlu1 %1516, %v1755_v25  }
 0x15e   :  { %v403_v35 = vpop.permute.xlu0 %402 }
 0x160   :  { %427 = vperm.xlu1 %1516, %v1781_v36  }
 0x162   :  { %v413_v37 = vpop.permute.xlu0 %412 }
 0x164   :  { %851 = vrot.lane.b32.xlu1 %v1781_v36, %s1643_s0 }
 0x166   :  { %v423_v38 = vpop.permute.xlu0 %422 }
 0x168   :  { %845 = vrot.lane.b32.xlu1 %v1746_v22, %s1643_s0 }
 0x16a   :  { %v433_v39 = vpop.permute.xlu0 %432 }
 0x16c   :  { %841 = vrot.lane.b32.xlu1 %v1732_v16, %s1643_s0 }
 0x16e   :  { %v854_v40 = vpop.permute.xlu0 %853 }
 0x16f   :  { %1418 = vmatprep.subr.mxu1 %v854_v40 }
 0x170   :  { %837 = vrot.lane.b32.xlu1 %v1744_v21, %s1643_s0  ;;  %1419 = vmatpush3.msra.mxu1 %v854_v40 }
 0x1b6   :  { %v351_v45 = vpop.permute.xlu1 %350 }
 0x1b7   :  { %v354_v46 = vsel %vm353_vm2, %v344_v28, %v351_v45  ;;  %v1835_v28 = vld [vmem:[#allocation2] sm:$0xff] }
 0x1b8   :  { %v1792_v47 = vrot.slane %v354_v46, %v437_v44  ;;  %vm567_vm5 = vcmp.ne.f32.partialorder %v1835_v28, 0.0 }
 0x1ba   :  { %v1795_v48 = vadd.f32 %v1792_v47, %v363_v43  ;;  %v1798_v49 = vadd.f32 %v1792_v47, %v358_v31  ;;  %v1801_v50 = vadd.f32 %v1792_v47, %v373_v32  ;;  %v1804_v51 = vadd.f32 %v1792_v47, %v383_v33 }
 0x1bb   :  { %v1807_v52 = vadd.f32 %v1792_v47, %v393_v34  ;;  %v1815_v62 = vadd.f32 %v1792_v47, %v403_v35  ;;  %v1819_v2 = vadd.f32 %v1792_v47, %v413_v37  ;;  %v1827_v8 = vadd.f32 %v1792_v47, %v423_v38 }
 0x1bc   :  { %v472_v53 = vmin.f32 %v1795_v48, 0.0  ;;  %v471_v54 = vmin.f32 %v1798_v49, 0.0  ;;  %v474_v55 = vmin.f32 %v1801_v50, 0.0  ;;  %v476_v56 = vmin.f32 %v1804_v51, 0.0 }
 0x1bd   :  { %v478_v61 = vmin.f32 %v1807_v52, 0.0  ;;  %v480_v1 = vmin.f32 %v1815_v62, 0.0  ;;  %v482_v7 = vmin.f32 %v1819_v2, 0.0  ;;  %v484_v31 = vmin.f32 %v1827_v8, 0.0 }
 0x1be   :  { %v489_v57 = vmul.f32 1.442695, %v472_v53  ;;  %v487_v58 = vmul.f32 1.442695, %v471_v54  ;;  %v493_v59 = vmul.f32 1.442695, %v474_v55  ;;  %v1839_v32 = vadd.f32 %v1792_v47, %v433_v39 }
 0x1bf   :  { %v497_v60 = vmul.f32 1.442695, %v476_v56  ;;  %v501_v0 = vmul.f32 1.442695, %v478_v61  ;;  %v505_v6 = vmul.f32 1.442695, %v480_v1 }
 0x1c0   :  { %1518 = vpow2.f32 %v489_v57  ;;  %v509_v30 = vmul.f32 1.442695, %v482_v7  ;;  %vm456_vm3 = vcmp.gt.f32.partialorder %v1795_v48, 0.0  ;;  %vm455_vm6 = vcmp.gt.f32.partialorder %v1798_v49, 0.0  ;;  %v1849_v39 = vld [vmem:[#allocation2 + $0x18] sm:$0xff] }
 0x1c1   :  { %1520 = vpow2.f32 %v487_v58  ;;  %v513_v44 = vmul.f32 1.442695, %v484_v31  ;;  %v486_v45 = vmin.f32 %v1839_v32, 0.0  ;;  %vm570_vm7 = vcmp.ne.f32.partialorder %v1849_v39, 0.0 }
 0x1c2   :  { %1522 = vpow2.f32 %v493_v59  ;;  %vm458_vm8 = vcmp.gt.f32.partialorder %v1801_v50, 0.0  ;;  %vm460_vm9 = vcmp.gt.f32.partialorder %v1804_v51, 0.0  ;;  %vm462_vm13 = vcmp.gt.f32.partialorder %v1807_v52, 0.0 }
 0x1c3   :  { %v368_v63 = vpop.permute.xlu1 %367  ;;  %1524 = vpow2.f32 %v497_v60  ;;  %vm464_vm1 = vcmp.gt.f32.partialorder %v1815_v62, 0.0 }
 0x1c4   :  { %v1822_v3 = vadd.f32 %v1792_v47, %v368_v63  ;;  %1526 = vpow2.f32 %v501_v0 }
 0x1c6   :  { %v473_v4 = vmin.f32 %v1822_v3, 0.0  ;;  %vm457_vm12 = vcmp.gt.f32.partialorder %v1822_v3, 0.0 }
 0x1c7   :  { %v378_v5 = vpop.permute.xlu1 %377 }
 0x1c8   :  { %v491_v9 = vmul.f32 1.442695, %v473_v4  ;;  %v1830_v10 = vadd.f32 %v1792_v47, %v378_v5  ;;  %v1876_v5 = vld [vmem:[#allocation2 + $0x28] sm:$0xff] }
 0x1c9   :  { %vm572_vm10 = vcmp.ne.f32.partialorder %v1876_v5, 0.0 }
 0x1ca   :  { %1528 = vpow2.f32 %v491_v9  ;;  %v475_v11 = vmin.f32 %v1830_v10, 0.0  ;;  %vm459_vm0 = vcmp.gt.f32.partialorder %v1830_v10, 0.0 }
 0x1cb   :  { %v388_v29 = vpop.permute.xlu1 %387  ;;  %1530 = vpow2.f32 %v505_v6  ;;  %v1878_v6 = vld [vmem:[#allocation2 + $0x10] sm:$0xff] }
 0x1cc   :  { %v495_v33 = vmul.f32 1.442695, %v475_v11  ;;  %v1842_v34 = vadd.f32 %v1792_v47, %v388_v29  ;;  %v1886_v11 = vpop.permute.xlu0 %849  ;;  %vm569_vm11 = vcmp.ne.f32.partialorder %v1878_v6, 0.0 }
 0x1cd   :  { %v1519_v35 = vpop.eup %1518 }
 0x1ce   :  { %v1521_v37 = vpop.eup %1520  ;;  %1532 = vpow2.f32 %v495_v33  ;;  %v477_v38 = vmin.f32 %v1842_v34, 0.0  ;;  %v1241_v40 = vadd.f32 -1.0, %v1519_v35 }
 0x1cf   :  { %v1523_v41 = vpop.eup %1522  ;;  %v398_v42 = vpop.permute.xlu1 %397  ;;  %v1240_v43 = vadd.f32 -1.0, %v1521_v37  ;;  %1534 = vpow2.f32 %v509_v30 }
 0x1d0   :  { %v1525_v46 = vpop.eup %1524  ;;  %v499_v53 = vmul.f32 1.442695, %v477_v38  ;;  %v1853_v54 = vadd.f32 %v1792_v47, %v398_v42  ;;  %v536_v55 = vsel %vm456_vm3, %v1795_v48, %v1241_v40  ;;  %v1243_v56 = vadd.f32 -1.0, %v1523_v41  ;;  %v1895_v40 = vld [vmem:[#allocation2 + $0x38] sm:$0xff]  ;;  %v1899_v41 = vld [vmem:[#allocation2 + $0x20] sm:$0xff] }
 0x1d1   :  { %v1860_v57 = vsel %vm568_vm4, %v536_v55, -1e+30  ;;  %v535_v58 = vsel %vm455_vm6, %v1798_v49, %v1240_v43  ;;  %v1245_v63 = vadd.f32 -1.0, %v1525_v46  ;;  %v517_v49 = vmul.f32 1.442695, %v486_v45  ;;  %v1527_v0 = vpop.eup %1526 }
 0x1d2   :  { %1536 = vpow2.f32 %v499_v53  ;;  %v479_v59 = vmin.f32 %v1853_v54, 0.0  ;;  %601 = vmax.xlane.f32.xlu0 %v1860_v57  ;;  %v1868_v60 = vsel %vm567_vm5, %v535_v58, -1e+30  ;;  %v538_v61 = vsel %vm458_vm8, %v1801_v50, %v1243_v56 }
 0x1d3   :  { %599 = vmax.xlane.f32.xlu1 %v1868_v60  ;;  %v408_v48 = vpop.permute.xlu1 %407  ;;  %1538 = vpow2.f32 %v513_v44  ;;  %v1883_v9 = vsel %vm570_vm7, %v538_v61, -1e+30  ;;  %v540_v30 = vsel %vm460_vm9, %v1804_v51, %v1245_v63  ;;  %v1247_v31 = vadd.f32 -1.0, %v1527_v0  ;;  %v848_v61 = vpop.permute.xlu0 %847 }
 0x1d4   :  { %v503_v1 = vmul.f32 1.442695, %v479_v59  ;;  %v1874_v4 = vadd.f32 %v1792_v47, %v408_v48  ;;  %v1904_v42 = vsel %vm572_vm10, %v540_v30, -1e+30  ;;  %vm574_vm14 = vcmp.ne.f32.partialorder %v1895_v40, 0.0  ;;  %v1919_v48 = vld [vmem:[#allocation2 + $0x48] sm:$0xff] }
 0x1d5   :  { %v542_v53 = vsel %vm462_vm13, %v1807_v52, %v1247_v31  ;;  %vm571_vm15 = vcmp.ne.f32.partialorder %v1899_v41, 0.0  ;;  %v1923_v52 = vld [vmem:[#allocation2 + $0x30] sm:$0xff]  ;;  %vm576_vm2 = vcmp.ne.f32.partialorder %v1919_v48, 0.0  ;;  %vm461_vm6 = vcmp.gt.f32.partialorder %v1842_v34, 0.0 }
 0x1d6   :  { %1540 = vpow2.f32 %v503_v1  ;;  %v481_v7 = vmin.f32 %v1874_v4, 0.0  ;;  %vm573_vm3 = vcmp.ne.f32.partialorder %v1923_v52, 0.0  ;;  %vm466_vm8 = vcmp.gt.f32.partialorder %v1819_v2, 0.0 }
 0x1d7   :  { %v1529_v50 = vpop.eup %1528  ;;  %605 = vmax.xlane.f32.xlu1 %v1883_v9  ;;  %v418_v29 = vpop.permute.xlu1 %417  ;;  %1542 = vpow2.f32 %v517_v49  ;;  %vm463_vm13 = vcmp.gt.f32.partialorder %v1853_v54, 0.0 }
 0x1d8   :  { %v1531_v33 = vpop.eup %1530  ;;  %v507_v35 = vmul.f32 1.442695, %v481_v7  ;;  %v1892_v37 = vadd.f32 %v1792_v47, %v418_v29  ;;  %v1242_v38 = vadd.f32 -1.0, %v1529_v50 }
 0x1d9   :  { %v1249_v55 = vadd.f32 -1.0, %v1531_v33 }
 0x1da   :  { %1544 = vpow2.f32 %v507_v35  ;;  %v483_v51 = vmin.f32 %v1892_v37, 0.0  ;;  %v537_v43 = vsel %vm457_vm12, %v1822_v3, %v1242_v38  ;;  %v1943_v35 = vld [vmem:[#allocation2 + $0x40] sm:$0xff] }
 0x1db   :  { %v1533_v44 = vpop.eup %1532  ;;  %609 = vmax.xlane.f32.xlu1 %v1904_v42  ;;  %v428_v45 = vpop.permute.xlu1 %427  ;;  %v1910_v46 = vsel %vm569_vm11, %v537_v43, -1e+30  ;;  %v544_v50 = vsel %vm464_vm1, %v1815_v62, %v1249_v55  ;;  %vm575_vm12 = vcmp.ne.f32.partialorder %v1943_v35, 0.0 }
 0x1dc   :  { %v1535_v56 = vpop.eup %1534  ;;  %v511_v58 = vmul.f32 1.442695, %v483_v51  ;;  %v1915_v59 = vadd.f32 %v1792_v47, %v428_v45  ;;  %603 = vmax.xlane.f32.xlu0 %v1910_v46  ;;  %v1244_v3 = vadd.f32 -1.0, %v1533_v44  ;;  %v1928_v47 = vsel %vm574_vm14, %v542_v53, -1e+30  ;;  %v844_v43 = vpop.permute.xlu0 %843 }
 0x1dd   :  { %v1251_v29 = vadd.f32 -1.0, %v1535_v56  ;;  %v1947_v62 = vsel %vm576_vm2, %v544_v50, -1e+30  ;;  %v1982_v50 = vld [vmem:[#allocation2 + $0x78] sm:$0xff] }
 0x1de   :  { %1546 = vpow2.f32 %v511_v58  ;;  %v485_v63 = vmin.f32 %v1915_v59, 0.0  ;;  %v539_v49 = vsel %vm459_vm0, %v1830_v10, %v1244_v3  ;;  %v1940_v10 = vld [vmem:[#allocation2 + $0x58] sm:$0xff]  ;;  %v1962_v58 = vld [vmem:[#allocation2 + $0x68] sm:$0xff]  ;;  %vm468_vm0 = vcmp.gt.f32.partialorder %v1827_v8, 0.0 }
 0x1df   :  { %v1537_v0 = vpop.eup %1536  ;;  %613 = vmax.xlane.f32.xlu1 %v1928_v47  ;;  %v852_v1 = vpop.permute.xlu1 %851  ;;  %v1934_v7 = vsel %vm571_vm15, %v539_v49, -1e+30  ;;  %v546_v53 = vsel %vm466_vm8, %v1819_v2, %v1251_v29  ;;  %vm578_vm9 = vcmp.ne.f32.partialorder %v1940_v10, 0.0  ;;  %vm2262_vm1 = vcmp.ne.f32.partialorder %v1962_v58, 0.0 }
 0x1e0   :  { %v1539_v30 = vpop.eup %1538  ;;  %v515_v31 = vmul.f32 1.442695, %v485_v63  ;;  %607 = vmax.xlane.f32.xlu0 %v1934_v7  ;;  %1420 = vmatprep.subr.mxu1 %v852_v1  ;;  %v1246_v33 = vadd.f32 -1.0, %v1537_v0  ;;  %v1969_v2 = vsel %vm578_vm9, %v546_v53, -1e+30  ;;  %v840_v29 = vpop.permute.xlu0 %839  ;;  %vm465_vm8 = vcmp.gt.f32.partialorder %v1874_v4, 0.0 }
 0x1e1   :  { %1421 = vmatpush3.msra.mxu1 %v852_v1  ;;  %v1253_v55 = vadd.f32 -1.0, %v1539_v30  ;;  %v1985_v30 = vld [vmem:[#allocation2 + $0x60] sm:$0xff] }
 0x1e2   :  { %1548 = vpow2.f32 %v515_v31  ;;  %1422 = vmatprep.subr.mxu1 %v1886_v11  ;;  %v541_v38 = vsel %vm461_vm6, %v1842_v34, %v1246_v33 }
 0x1e3   :  { %v1541_v51 = vpop.eup %1540  ;;  %617 = vmax.xlane.f32.xlu1 %v1947_v62  ;;  %1423 = vmatpush3.msra.mxu1 %v1886_v11  ;;  %v846_v44 = vpop.permute.xlu1 %845  ;;  %v1956_v45 = vsel %vm573_vm3, %v541_v38, -1e+30  ;;  %v1965_v11 = vld [vmem:[#allocation2 + $0x50] sm:$0xff]  ;;  %v548_v0 = vsel %vm468_vm0, %v1827_v8, %v1253_v55  ;;  %vm2263_vm0 = vcmp.ne.f32.partialorder %v1982_v50, 0.0 }
 0x1e4   :  { %v1543_v56 = vpop.eup %1542  ;;  %611 = vmax.xlane.f32.xlu0 %v1956_v45  ;;  %1424 = vmatprep.subr.mxu1 %v848_v61  ;;  %v1248_v34 = vadd.f32 -1.0, %v1541_v51  ;;  %vm577_vm6 = vcmp.ne.f32.partialorder %v1965_v11, 0.0  ;;  %v1989_v8 = vsel %vm2262_vm1, %v548_v0, -1e+30  ;;  %vm467_vm1 = vcmp.gt.f32.partialorder %v1892_v37, 0.0 }
 0x1e5   :  { %1425 = vmatpush3.msra.mxu1 %v848_v61  ;;  %v1255_v1 = vadd.f32 -1.0, %v1543_v56  ;;  %v836_v56 = vpop.permute.xlu0 %835 }
 0x1e6   :  { %1426 = vmatprep.subr.mxu1 %v846_v44  ;;  %v543_v3 = vsel %vm463_vm13, %v1853_v54, %v1248_v34  ;;  %vm470_vm13 = vcmp.gt.f32.partialorder %v1839_v32, 0.0 }
 0x1e7   :  { %v1545_v63 = vpop.eup %1544  ;;  %621 = vmax.xlane.f32.xlu1 %v1969_v2  ;;  %1427 = vmatpush3.msra.mxu1 %v846_v44  ;;  %v842_v49 = vpop.permute.xlu1 %841  ;;  %v1976_v61 = vsel %vm575_vm12, %v543_v3, -1e+30  ;;  %v550_v51 = vsel %vm470_vm13, %v1839_v32, %v1255_v1  ;;  %v2003_v44 = vld [vmem:[#allocation2 + $0x70] sm:$0xff] }
 0x1e8   :  { %615 = vmax.xlane.f32.xlu0 %v1976_v61  ;;  %1428 = vmatprep.subr.mxu1 %v844_v43  ;;  %v1250_v54 = vadd.f32 -1.0, %v1545_v63  ;;  %v2007_v53 = vsel %vm2263_vm0, %v550_v51, -1e+30  ;;  %vm2264_vm13 = vcmp.ne.f32.partialorder %v2003_v44, 0.0  ;;  %vm469_vm0 = vcmp.gt.f32.partialorder %v1915_v59, 0.0 }
 0x1e9   :  { %1429 = vmatpush3.msra.mxu1 %v844_v43 }
 0x1ea   :  { %1430 = vmatprep.subr.mxu1 %v842_v49  ;;  %v545_v31 = vsel %vm465_vm8, %v1874_v4, %v1250_v54  ;;  %vm2265_vm8 = vcmp.ne.f32.partialorder %v1985_v30, 0.0 }
 0x1eb   :  { %v1547_v33 = vpop.eup %1546  ;;  %625 = vmax.xlane.f32.xlu1 %v1989_v8  ;;  %1431 = vmatpush3.msra.mxu1 %v842_v49  ;;  %v1996_v38 = vsel %vm577_vm6, %v545_v31, -1e+30  ;;  %v838_v4 = vpop.permute.xlu1 %837 }
 0x1ec   :  { %619 = vmax.xlane.f32.xlu0 %v1996_v38  ;;  %1432 = vmatprep.subr.mxu1 %v840_v29  ;;  %v1252_v43 = vadd.f32 -1.0, %v1547_v33 }
 0x1ed   :  { %1433 = vmatpush3.msra.mxu1 %v840_v29 }
 0x1ee   :  { %1434 = vmatprep.subr.mxu1 %v838_v4  ;;  %v547_v32 = vsel %vm467_vm1, %v1892_v37, %v1252_v43 }
 0x1ef   :  { %v1549_v55 = vpop.eup %1548  ;;  %629 = vmax.xlane.f32.xlu1 %v2007_v53  ;;  %1435 = vmatpush3.msra.mxu1 %v838_v4  ;;  %v2013_v34 = vsel %vm2265_vm8, %v547_v32, -1e+30 }
 0x1f0   :  { %623 = vmax.xlane.f32.xlu0 %v2013_v34  ;;  %1436 = vmatprep.subr.mxu1 %v836_v56  ;;  %v1254_v3 = vadd.f32 -1.0, %v1549_v55 }
 0x1f1   :  { %1437 = vmatpush3.msra.mxu1 %v836_v56 }
 0x1f2   :  { %v549_v37 = vsel %vm469_vm0, %v1915_v59, %v1254_v3 }
 0x1f3   :  { %v2021_v63 = vsel %vm2264_vm13, %v549_v37, -1e+30 }
 0x1f4   :  { %627 = vmax.xlane.f32.xlu0 %v2021_v63 }
 0x200   :  { %833 = vrot.lane.b32.xlu1 %v1737_v18, %s1643_s0 }
 0x204   :  { %829 = vrot.lane.b32.xlu1 %v1730_v15, %s1643_s0 }
 0x208   :  { %825 = vrot.lane.b32.xlu1 %v1724_v13, %s1643_s0 }
 0x20a   :  { %831 = vrot.lane.b32.xlu0 %v1741_v20, %s1643_s0 }
 0x20e   :  { %827 = vrot.lane.b32.xlu0 %v1734_v17, %s1643_s0 }
 0x25b   :  { %v602_v59 = vpop.xlane.xlu0 %601 }
 0x25c   :  { %vm632_vm1 = vcmp.gt.f32.partialorder %v602_v59, -5e+29  ;;  %v600_v49 = vpop.xlane.xlu1 %599 }
 0x25d   :  { %v648_v0 = vsel %vm632_vm1, %v602_v59, 0.0  ;;  %vm631_vm0 = vcmp.gt.f32.partialorder %v600_v49, -5e+29 }
 0x25e   :  { %v664_v1 = vsub.f32 %v1860_v57, %v648_v0  ;;  %v647_v54 = vsel %vm631_vm0, %v600_v49, 0.0 }
 0x25f   :  { %v663_v29 = vsub.f32 %v1868_v60, %v647_v54 }
 0x260   :  { %v606_v31 = vpop.xlane.xlu1 %605  ;;  %v681_v33 = vmul.f32 1.442695, %v664_v1 }
 0x261   :  { %v679_v51 = vmul.f32 1.442695, %v663_v29  ;;  %vm634_vm13 = vcmp.gt.f32.partialorder %v606_v31, -5e+29 }
 0x262   :  { %v650_v43 = vsel %vm634_vm13, %v606_v31, 0.0 }
 0x263   :  { %1550 = vpow2.f32 %v679_v51  ;;  %v666_v4 = vsub.f32 %v1883_v9, %v650_v43 }
 0x264   :  { %v610_v32 = vpop.xlane.xlu1 %609  ;;  %1552 = vpow2.f32 %v681_v33 }
 0x265   :  { %v685_v55 = vmul.f32 1.442695, %v666_v4  ;;  %vm636_vm8 = vcmp.gt.f32.partialorder %v610_v32, -5e+29  ;;  %v604_v56 = vpop.xlane.xlu0 %603 }
 0x266   :  { %v652_v3 = vsel %vm636_vm8, %v610_v32, 0.0  ;;  %vm633_vm1 = vcmp.gt.f32.partialorder %v604_v56, -5e+29 }
 0x267   :  { %v668_v57 = vsub.f32 %v1904_v42, %v652_v3  ;;  %v649_v37 = vsel %vm633_vm1, %v604_v56, 0.0  ;;  %1554 = vpow2.f32 %v685_v55 }
 0x268   :  { %v665_v60 = vsub.f32 %v1910_v46, %v649_v37  ;;  %v614_v59 = vpop.xlane.xlu1 %613 }
 0x269   :  { %v689_v49 = vmul.f32 1.442695, %v668_v57  ;;  %vm638_vm0 = vcmp.gt.f32.partialorder %v614_v59, -5e+29  ;;  %v608_v0 = vpop.xlane.xlu0 %607 }
 0x26a   :  { %v683_v1 = vmul.f32 1.442695, %v665_v60  ;;  %v654_v54 = vsel %vm638_vm0, %v614_v59, 0.0  ;;  %vm635_vm13 = vcmp.gt.f32.partialorder %v608_v0, -5e+29 }
 0x26b   :  { %v670_v9 = vsub.f32 %v1928_v47, %v654_v54  ;;  %v651_v29 = vsel %vm635_vm13, %v608_v0, 0.0 }
 0x26c   :  { %1556 = vpow2.f32 %v683_v1  ;;  %v667_v31 = vsub.f32 %v1934_v7, %v651_v29  ;;  %v618_v33 = vpop.xlane.xlu1 %617 }
 0x26d   :  { %1558 = vpow2.f32 %v689_v49  ;;  %v693_v42 = vmul.f32 1.442695, %v670_v9  ;;  %vm640_vm8 = vcmp.gt.f32.partialorder %v618_v33, -5e+29  ;;  %v612_v51 = vpop.xlane.xlu0 %611 }
 0x26e   :  { %v687_v46 = vmul.f32 1.442695, %v667_v31  ;;  %v656_v43 = vsel %vm640_vm8, %v618_v33, 0.0  ;;  %vm637_vm1 = vcmp.gt.f32.partialorder %v612_v51, -5e+29 }
 0x26f   :  { %v672_v4 = vsub.f32 %v1947_v62, %v656_v43  ;;  %v653_v32 = vsel %vm637_vm1, %v612_v51, 0.0 }
 0x270   :  { %v1551_v55 = vpop.eup %1550  ;;  %1560 = vpow2.f32 %v687_v46  ;;  %v669_v56 = vsub.f32 %v1956_v45, %v653_v32  ;;  %v622_v47 = vpop.xlane.xlu1 %621 }
 0x271   :  { %1562 = vpow2.f32 %v693_v42  ;;  %v697_v3 = vmul.f32 1.442695, %v672_v4  ;;  %vm642_vm0 = vcmp.gt.f32.partialorder %v622_v47, -5e+29  ;;  %v616_v7 = vpop.xlane.xlu0 %615  ;;  %v2045_v57 = vsel %vm567_vm5, %v1551_v55, 0.0  ;;  %v1553_v37 = vpop.eup %1552 }
 0x272   :  { %v691_v60 = vmul.f32 1.442695, %v669_v56  ;;  %v658_v59 = vsel %vm642_vm0, %v622_v47, 0.0  ;;  %vm639_vm13 = vcmp.gt.f32.partialorder %v616_v7, -5e+29  ;;  %727 = vadd.xlane.f32.xlu1 %v2045_v57  ;;  %v2052_v28 = vsel %vm568_vm4, %v1553_v37, 0.0 }
 0x273   :  { %v674_v62 = vsub.f32 %v1969_v2, %v658_v59  ;;  %v655_v49 = vsel %vm639_vm13, %v616_v7, 0.0 }
 0x274   :  { %1564 = vpow2.f32 %v691_v60  ;;  %v671_v45 = vsub.f32 %v1976_v61, %v655_v49  ;;  %v626_v0 = vpop.xlane.xlu1 %625  ;;  %v1555_v9 = vpop.eup %1554 }
 0x275   :  { %1566 = vpow2.f32 %v697_v3  ;;  %v701_v1 = vmul.f32 1.442695, %v674_v62  ;;  %vm644_vm8 = vcmp.gt.f32.partialorder %v626_v0, -5e+29  ;;  %v620_v54 = vpop.xlane.xlu0 %619  ;;  %v2059_v43 = vsel %vm570_vm7, %v1555_v9, 0.0 }
 0x276   :  { %v695_v29 = vmul.f32 1.442695, %v671_v45  ;;  %v660_v31 = vsel %vm644_vm8, %v626_v0, 0.0  ;;  %vm641_vm5 = vcmp.gt.f32.partialorder %v620_v54, -5e+29  ;;  %729 = vadd.xlane.f32.xlu1 %v2052_v28 }
 0x277   :  { %v676_v2 = vsub.f32 %v1989_v8, %v660_v31  ;;  %v657_v33 = vsel %vm641_vm5, %v620_v54, 0.0 }
 0x278   :  { %1568 = vpow2.f32 %v695_v29  ;;  %v673_v61 = vsub.f32 %v1996_v38, %v657_v33  ;;  %v630_v42 = vpop.xlane.xlu1 %629 }
 0x279   :  { %v1557_v51 = vpop.eup %1556  ;;  %1570 = vpow2.f32 %v701_v1  ;;  %v705_v46 = vmul.f32 1.442695, %v676_v2  ;;  %vm646_vm1 = vcmp.gt.f32.partialorder %v630_v42, -5e+29  ;;  %v624_v12 = vpop.xlane.xlu0 %623 }
 0x27a   :  { %v1559_v4 = vpop.eup %1558  ;;  %v699_v32 = vmul.f32 1.442695, %v673_v61  ;;  %v662_v55 = vsel %vm646_vm1, %v630_v42, 0.0  ;;  %vm643_vm4 = vcmp.gt.f32.partialorder %v624_v12, -5e+29  ;;  %733 = vadd.xlane.f32.xlu1 %v2059_v43  ;;  %v2064_v8 = vsel %vm569_vm11, %v1557_v51, 0.0 }
 0x27b   :  { %v678_v38 = vsub.f32 %v2007_v53, %v662_v55  ;;  %v659_v56 = vsel %vm643_vm4, %v624_v12, 0.0  ;;  %731 = vadd.xlane.f32.xlu0 %v2064_v8  ;;  %v2071_v60 = vsel %vm572_vm10, %v1559_v4, 0.0  ;;  %vm2266_vm10 = vcmp.ne.f32.partialorder %v1962_v58, 0.0 }
 0x27c   :  { %1572 = vpow2.f32 %v699_v32  ;;  %v675_v39 = vsub.f32 %v2013_v34, %v659_v56  ;;  %v834_v47 = vpop.permute.xlu1 %833  ;;  %vm2267_vm11 = vcmp.ne.f32.partialorder %v1985_v30, 0.0 }
 0x27d   :  { %v1561_v3 = vpop.eup %1560  ;;  %1574 = vpow2.f32 %v705_v46  ;;  %v709_v7 = vmul.f32 1.442695, %v678_v38  ;;  %1438 = vmatprep.subr.mxu1 %v834_v47  ;;  %v628_v37 = vpop.xlane.xlu0 %627 }
 0x27e   :  { %v1563_v6 = vpop.eup %1562  ;;  %v703_v59 = vmul.f32 1.442695, %v675_v39  ;;  %vm645_vm7 = vcmp.gt.f32.partialorder %v628_v37, -5e+29  ;;  %737 = vadd.xlane.f32.xlu1 %v2071_v60  ;;  %1439 = vmatpush3.msra.mxu1 %v834_v47  ;;  %v2076_v53 = vsel %vm571_vm15, %v1561_v3, 0.0  ;;  %vm2269_vm15 = vcmp.ne.f32.partialorder %v2003_v44, 0.0 }
 0x27f   :  { %v661_v34 = vsel %vm645_vm7, %v628_v37, 0.0  ;;  %735 = vadd.xlane.f32.xlu0 %v2076_v53  ;;  %v2082_v0 = vsel %vm574_vm14, %v1563_v6, 0.0  ;;  %vm2268_vm14 = vcmp.ne.f32.partialorder %v1982_v50, 0.0 }
 0x280   :  { %1576 = vpow2.f32 %v703_v59  ;;  %v677_v62 = vsub.f32 %v2021_v63, %v661_v34  ;;  %v830_v5 = vpop.permute.xlu1 %829 }
 0x281   :  { %v1565_v49 = vpop.eup %1564  ;;  %1578 = vpow2.f32 %v709_v7  ;;  %v832_v45 = vpop.permute.xlu0 %831 }
 0x282   :  { %v1567_v1 = vpop.eup %1566  ;;  %v707_v54 = vmul.f32 1.442695, %v677_v62  ;;  %741 = vadd.xlane.f32.xlu1 %v2082_v0  ;;  %1440 = vmatprep.subr.mxu1 %v832_v45  ;;  %v2087_v41 = vsel %vm573_vm3, %v1565_v49, 0.0 }
 0x283   :  { %739 = vadd.xlane.f32.xlu0 %v2087_v41  ;;  %1441 = vmatpush3.msra.mxu1 %v832_v45  ;;  %v2092_v40 = vsel %vm576_vm2, %v1567_v1, 0.0 }
 0x284   :  { %1580 = vpow2.f32 %v707_v54  ;;  %1442 = vmatprep.subr.mxu1 %v830_v5  ;;  %v826_v31 = vpop.permute.xlu1 %825 }
 0x285   :  { %v1569_v63 = vpop.eup %1568  ;;  %v828_v9 = vpop.permute.xlu0 %827  ;;  %1443 = vmatpush3.msra.mxu1 %v830_v5 }
 0x286   :  { %v1571_v29 = vpop.eup %1570  ;;  %745 = vadd.xlane.f32.xlu1 %v2092_v40  ;;  %1444 = vmatprep.subr.mxu1 %v828_v9  ;;  %v2097_v52 = vsel %vm575_vm12, %v1569_v63, 0.0 }
 0x287   :  { %743 = vadd.xlane.f32.xlu0 %v2097_v52  ;;  %1445 = vmatpush3.msra.mxu1 %v828_v9  ;;  %v2102_v48 = vsel %vm578_vm9, %v1571_v29, 0.0 }
 0x288   :  { %1446 = vmatprep.subr.mxu1 %v826_v31 }
 0x289   :  { %v1573_v2 = vpop.eup %1572  ;;  %1447 = vmatpush3.msra.mxu1 %v826_v31 }
 0x28a   :  { %v1575_v33 = vpop.eup %1574  ;;  %749 = vadd.xlane.f32.xlu1 %v2102_v48  ;;  %v2107_v61 = vsel %vm577_vm6, %v1573_v2, 0.0 }
 0x28b   :  { %747 = vadd.xlane.f32.xlu0 %v2107_v61  ;;  %v2112_v42 = vsel %vm2266_vm10, %v1575_v33, 0.0 }
 0x28d   :  { %v1577_v35 = vpop.eup %1576 }
 0x28e   :  { %v1579_v51 = vpop.eup %1578  ;;  %753 = vadd.xlane.f32.xlu1 %v2112_v42  ;;  %v2117_v10 = vsel %vm2267_vm11, %v1577_v35, 0.0 }
 0x28f   :  { %751 = vadd.xlane.f32.xlu0 %v2117_v10  ;;  %v2122_v11 = vsel %vm2268_vm14, %v1579_v51, 0.0 }
 0x291   :  { %v1581_v46 = vpop.eup %1580 }
 0x292   :  { %757 = vadd.xlane.f32.xlu1 %v2122_v11  ;;  %v2127_v58 = vsel %vm2269_vm15, %v1581_v46, 0.0 }
 0x293   :  { %755 = vadd.xlane.f32.xlu0 %v2127_v58 }
 0x2a3   :  { %1078 = vrot.lane.b32.xlu1 %v1758_v26, %s1645_s12 }
 0x2a7   :  { %1074 = vrot.lane.b32.xlu1 %v1752_v24, %s1645_s12 }
 0x2a9   :  { %823 = vrot.lane.b32.xlu0 %v1727_v14, %s1643_s0 }
 0x2ab   :  { %1070 = vrot.lane.b32.xlu1 %v1746_v22, %s1645_s12 }
 0x2ad   :  { %1076 = vrot.lane.b32.xlu0 %v1781_v36, %s1645_s12 }
 0x2af   :  { %1066 = vrot.lane.b32.xlu1 %v1732_v16, %s1645_s12 }
 0x2b1   :  { %1072 = vrot.lane.b32.xlu0 %v1755_v25, %s1645_s12 }
 0x2b3   :  { %1062 = vrot.lane.b32.xlu1 %v1744_v21, %s1645_s12 }
 0x2b5   :  { %1068 = vrot.lane.b32.xlu0 %v1749_v23, %s1645_s12 }
 0x2b7   :  { %1058 = vrot.lane.b32.xlu1 %v1737_v18, %s1645_s12 }
 0x2b9   :  { %1064 = vrot.lane.b32.xlu0 %v1739_v19, %s1645_s12 }
 0x2bb   :  { %1054 = vrot.lane.b32.xlu1 %v1730_v15, %s1645_s12 }
 0x2bd   :  { %1060 = vrot.lane.b32.xlu0 %v1771_v27, %s1645_s12 }
 0x2bf   :  { %1050 = vrot.lane.b32.xlu1 %v1724_v13, %s1645_s12 }
 0x2c1   :  { %1056 = vrot.lane.b32.xlu0 %v1741_v20, %s1645_s12 }
 0x2c5   :  { %1052 = vrot.lane.b32.xlu0 %v1734_v17, %s1645_s12 }
 0x2c9   :  { %1048 = vrot.lane.b32.xlu0 %v1727_v14, %s1645_s12 }
 0x2fb   :  { %v728_v50 = vpop.xlane.xlu1 %727 }
 0x2fc   :  { %vm759_vm2 = vcmp.gt.f32.partialorder %v728_v50, 0.0 }
 0x2fd   :  { %v775_v30 = vsel %vm759_vm2, %v728_v50, 1.0  ;;  %vm1201_vm2 = vcmask 130048  }
 0x2fe   :  { %1582 = vrcp.f32 %v775_v30 }
 0x2ff   :  { %v730_v44 = vpop.xlane.xlu1 %729 }
 0x300   :  { %vm760_vm3 = vcmp.gt.f32.partialorder %v730_v44, 0.0 }
 0x301   :  { %v776_v3 = vsel %vm760_vm3, %v730_v44, 1.0 }
 0x302   :  { %1584 = vrcp.f32 %v776_v3 }
 0x303   :  { %v734_v12 = vpop.xlane.xlu1 %733 }
 0x304   :  { %v732_v4 = vpop.xlane.xlu0 %731  ;;  %vm762_vm12 = vcmp.gt.f32.partialorder %v734_v12, 0.0 }
 0x305   :  { %vm761_vm9 = vcmp.gt.f32.partialorder %v732_v4, 0.0  ;;  %v778_v59 = vsel %vm762_vm12, %v734_v12, 1.0 }
 0x306   :  { %v777_v7 = vsel %vm761_vm9, %v732_v4, 1.0 }
 0x307   :  { %v738_v32 = vpop.xlane.xlu1 %737  ;;  %1586 = vrcp.f32 %v777_v7 }
 0x308   :  { %v736_v55 = vpop.xlane.xlu0 %735  ;;  %vm764_vm8 = vcmp.gt.f32.partialorder %v738_v32, 0.0 }
 0x309   :  { %vm763_vm6 = vcmp.gt.f32.partialorder %v736_v55, 0.0  ;;  %v780_v45 = vsel %vm764_vm8, %v738_v32, 1.0 }
 0x30a   :  { %v779_v62 = vsel %vm763_vm6, %v736_v55, 1.0 }
 0x30b   :  { %v1583_v38 = vpop.eup %1582  ;;  %v742_v56 = vpop.xlane.xlu1 %741 }
 0x30c   :  { %v740_v39 = vpop.xlane.xlu0 %739  ;;  %v2149_v47 = vmul.f32 %v1583_v38, %v2045_v57  ;;  %vm766_vm7 = vcmp.gt.f32.partialorder %v742_v56, 0.0 }
 0x30d   :  { %vm765_vm5 = vcmp.gt.f32.partialorder %v740_v39, 0.0  ;;  %v782_v31 = vsel %vm766_vm7, %v742_v56, 1.0 }
 0x30e   :  { %1450 = vmatprep.mubr.f32.mxu1 %v2149_v47  ;;  %v781_v54 = vsel %vm765_vm5, %v740_v39, 1.0 }
 0x30f   :  { %v746_v37 = vpop.xlane.xlu1 %745  ;;  %v1585_v46 = vpop.eup %1584 }
 0x310   :  { %vm768_vm0 = vcmp.gt.f32.partialorder %v746_v37, 0.0  ;;  %v744_v6 = vpop.xlane.xlu0 %743  ;;  %v794_v38 = vmul.f32 %v1585_v46, %v2052_v28 }
 0x311   :  { %v784_v34 = vsel %vm768_vm0, %v746_v37, 1.0  ;;  %vm767_vm13 = vcmp.gt.f32.partialorder %v744_v6, 0.0 }
 0x312   :  { %1588 = vrcp.f32 %v784_v34  ;;  %v783_v49 = vsel %vm767_vm13, %v744_v6, 1.0 }
 0x313   :  { %1590 = vrcp.f32 %v783_v49  ;;  %v750_v57 = vpop.xlane.xlu1 %749 }
 0x314   :  { %1592 = vrcp.f32 %v778_v59  ;;  %vm770_vm1 = vcmp.gt.f32.partialorder %v750_v57, 0.0  ;;  %v748_v5 = vpop.xlane.xlu0 %747  ;;  %v1587_v30 = vpop.eup %1586 }
 0x315   :  { %1594 = vrcp.f32 %v779_v62  ;;  %v786_v1 = vsel %vm770_vm1, %v750_v57, 1.0  ;;  %vm769_vm4 = vcmp.gt.f32.partialorder %v748_v5, 0.0  ;;  %v796_v37 = vmul.f32 %v1587_v30, %v2064_v8 }
 0x316   :  { %1596 = vrcp.f32 %v786_v1  ;;  %v785_v63 = vsel %vm769_vm4, %v748_v5, 1.0 }
 0x317   :  { %1598 = vrcp.f32 %v785_v63  ;;  %v754_v9 = vpop.xlane.xlu1 %753 }
 0x318   :  { %1600 = vrcp.f32 %v780_v45  ;;  %vm772_vm10 = vcmp.gt.f32.partialorder %v754_v9, 0.0  ;;  %v752_v29 = vpop.xlane.xlu0 %751 }
 0x319   :  { %1602 = vrcp.f32 %v781_v54  ;;  %v788_v2 = vsel %vm772_vm10, %v754_v9, 1.0  ;;  %vm771_vm11 = vcmp.gt.f32.partialorder %v752_v29, 0.0 }
 0x31a   :  { %1604 = vrcp.f32 %v788_v2  ;;  %v787_v33 = vsel %vm771_vm11, %v752_v29, 1.0 }
 0x31b   :  { %1606 = vrcp.f32 %v787_v33  ;;  %v758_v35 = vpop.xlane.xlu1 %757 }
 0x31c   :  { %1608 = vrcp.f32 %v782_v31  ;;  %vm774_vm14 = vcmp.gt.f32.partialorder %v758_v35, 0.0  ;;  %v756_v51 = vpop.xlane.xlu0 %755 }
 0x31d   :  { %v790_v50 = vsel %vm774_vm14, %v758_v35, 1.0  ;;  %vm773_vm15 = vcmp.gt.f32.partialorder %v756_v51, 0.0  ;;  %v1044_v35 = vld [vmem:[#allocation2 + $0xa0] sm:$0xff] }
 0x31e   :  { %1610 = vrcp.f32 %v790_v50  ;;  %v789_v44 = vsel %vm773_vm15, %v756_v51, 1.0 }
 0x31f   :  { %v1589_v12 = vpop.eup %1588  ;;  %1612 = vrcp.f32 %v789_v44  ;;  %v1079_v4 = vpop.permute.xlu1 %1078 }
 0x320   :  { %v1591_v32 = vpop.eup %1590  ;;  %1315 = vmatprep.subr.mxu0 %v1079_v4  ;;  %v824_v55 = vpop.permute.xlu0 %823  ;;  %v810_v56 = vmul.f32 %v1589_v12, %v2092_v40 }
 0x321   :  { %v1593_v39 = vpop.eup %1592  ;;  %1448 = vmatprep.subr.mxu1 %v824_v55  ;;  %v808_v3 = vmul.f32 %v1591_v32, %v2097_v52 }
 0x322   :  { %v1595_v7 = vpop.eup %1594  ;;  %1449 = vmatpush3.msra.mxu1 %v824_v55  ;;  %v2156_v6 = vadd.f32 %v810_v56, %v794_v38  ;;  %v798_v28 = vmul.f32 %v1593_v39, %v2059_v43 }
 0x323   :  { %v1597_v59 = vpop.eup %1596  ;;  %1451 = vmatmul.mubr.f32.vlgmr.msra.gmra.mxu1 %v794_v38  ;;  %1474 = vmatprep.subr.mxu1 %v1079_v4  ;;  %v2159_v34 = vadd.f32 %v808_v3, %v2149_v47  ;;  %v800_v8 = vmul.f32 %v1595_v7, %v2076_v53  ;;  %v1075_v38 = vpop.permute.xlu1 %1074 }
 0x324   :  { %v1599_v62 = vpop.eup %1598  ;;  %1453 = vmatprep.mubr.f32.mxu1 %v796_v37  ;;  %v814_v40 = vmul.f32 %v1597_v59, %v2102_v48  ;;  %v1077_v4 = vpop.permute.xlu0 %1076 }
 0x325   :  { %v1601_v49 = vpop.eup %1600  ;;  %v812_v52 = vmul.f32 %v1599_v62, %v2107_v61 }
 0x326   :  { %v1603_v57 = vpop.eup %1602  ;;  %v2165_v5 = vadd.f32 %v814_v40, %v798_v28  ;;  %v802_v54 = vmul.f32 %v1601_v49, %v2071_v60 }
 0x327   :  { %v1605_v45 = vpop.eup %1604  ;;  %1454 = vmatmul.mubr.f32.gmra.mxu1 %v798_v28  ;;  %v2167_v1 = vadd.f32 %v812_v52, %v796_v37  ;;  %v804_v61 = vmul.f32 %v1603_v57, %v2087_v41  ;;  %v1040_v41 = vld [vmem:[#allocation2 + $0x80] sm:$0xff]  ;;  %v1071_v37 = vpop.permute.xlu1 %1070 }
 0x328   :  { %v1607_v47 = vpop.eup %1606  ;;  %1456 = vmatprep.mubr.f32.mxu1 %v800_v8  ;;  %v818_v43 = vmul.f32 %v1605_v45, %v2112_v42  ;;  %1160 = vmatprep.mubr.f32.mxu0 %v1040_v41  ;;  %v1073_v39 = vpop.permute.xlu0 %1072 }
 0x329   :  { %v1609_v63 = vpop.eup %1608  ;;  %v816_v48 = vmul.f32 %v1607_v47, %v2117_v10 }
 0x32a   :  { %v2173_v9 = vadd.f32 %v818_v43, %v802_v54  ;;  %v806_v2 = vmul.f32 %v1609_v63, %v2082_v0 }
 0x32b   :  { %v1611_v53 = vpop.eup %1610  ;;  %1457 = vmatmul.mubr.f32.gmra.mxu1 %v802_v54  ;;  %v2175_v29 = vadd.f32 %v816_v48, %v800_v8 }
 0x32c   :  { %v1613_v31 = vpop.eup %1612  ;;  %1459 = vmatprep.mubr.f32.mxu1 %v804_v61  ;;  %v822_v33 = vmul.f32 %v1611_v53, %v2122_v11  ;;  %v1069_v62 = vpop.permute.xlu0 %1068 }
 0x32d   :  { %v820_v60 = vmul.f32 %v1613_v31, %v2127_v58  ;;  %v1045_v31 = vld [vmem:[#allocation2 + $0xa8] sm:$0xff] }
 0x32e   :  { %v2180_v42 = vadd.f32 %v822_v33, %v806_v2 }
 0x32f   :  { %1460 = vmatmul.mubr.f32.gmra.mxu1 %v806_v2  ;;  %v2182_v10 = vadd.f32 %v820_v60, %v804_v61  ;;  %v1046_v2 = vld [vmem:[#allocation2 + $0xb0] sm:$0xff] }
 0x330   :  { %1462 = vmatprep.mubr.f32.mxu1 %v808_v3  ;;  %v1065_v8 = vpop.permute.xlu0 %1064 }
 0x333   :  { %1463 = vmatmul.mubr.f32.gmra.mxu1 %v810_v56 }
 0x334   :  { %1465 = vmatprep.mubr.f32.mxu1 %v812_v52  ;;  %v1067_v52 = vpop.permute.xlu1 %1066  ;;  %v1061_v47 = vpop.permute.xlu0 %1060 }
 0x337   :  { %1466 = vmatmul.mubr.f32.gmra.mxu1 %v814_v40 }
 0x338   :  { %1468 = vmatprep.mubr.f32.mxu1 %v816_v48 }
 0x33b   :  { %1469 = vmatmul.mubr.f32.gmra.mxu1 %v818_v43  ;;  %v1057_v43 = vpop.permute.xlu0 %1056 }
 0x33c   :  { %1471 = vmatprep.mubr.f32.mxu1 %v820_v60 }
 0x33f   :  { %1472 = vmatmul.mubr.f32.gmra.mxu1 %v822_v33  ;;  %v1047_v33 = vld [vmem:[#allocation2 + $0xb8] sm:$0xff] }
 0x340   :  { %1180 = vmatprep.mubr.f32.mxu1 %v1044_v35 }
 0x3e3   :  { %v2184_v0 = vpop.f32.mrf.mxu1 }
 0x3e4   :  { %v1017_v61 = vadd.f32 %v2184_v0, %v1724_v13  ;;  %v1042_v13 = vld [vmem:[#allocation2 + $0x90] sm:$0xff] }
 0x3e5   :  { %v2186_v11 = vpop.f32.mrf.mxu1 }
 0x3e6   :  { %v1016_v53 = vadd.f32 %v2186_v11, %v1727_v14  ;;  %v1043_v14 = vld [vmem:[#allocation2 + $0x98] sm:$0xff] }
 0x3e7   :  { %v2188_v58 = vpop.f32.mrf.mxu1 }
 0x3e8   :  { %v1019_v48 = vadd.f32 %v2188_v58, %v1730_v15 }
 0x3e9   :  { %v2190_v51 = vpop.f32.mrf.mxu1 }
 0x3eb   :  { %v2192_v46 = vpop.f32.mrf.mxu1 }
 0x3ed   :  { %v2194_v50 = vpop.f32.mrf.mxu1 }
 0x3ef   :  { %v1461_v30 = vpop.f32.mrf.mxu1 }
 0x3f1   :  { %v967_v44 = vpop.f32.mrf.mxu1 }
 0x3f3   :  { %v1464_v12 = vpop.f32.mrf.mxu1 }
 0x3f5   :  { %v977_v32 = vpop.f32.mrf.mxu1 }
 0x3f7   :  { %v1467_v55 = vpop.f32.mrf.mxu1 }
 0x3f9   :  { %v987_v56 = vpop.f32.mrf.mxu1 }
 0x3fb   :  { %v1470_v3 = vpop.f32.mrf.mxu1 }
 0x3fc   :  { %v1029_v57 = vadd.f32 %v1470_v3, %v1752_v24  ;;  %v1026_v24 = vadd.f32 %v987_v56, %v1749_v23  ;;  %v1023_v23 = vadd.f32 %v1461_v30, %v1744_v21  ;;  %v1020_v21 = vadd.f32 %v2194_v50, %v1741_v20 }
 0x3fd   :  { %v997_v7 = vpop.f32.mrf.mxu1 }
 0x3fe   :  { %v1028_v45 = vadd.f32 %v997_v7, %v1755_v25  ;;  %v1025_v25 = vadd.f32 %v1464_v12, %v1732_v16  ;;  %v1022_v16 = vadd.f32 %v967_v44, %v1771_v27  ;;  %v1053_v27 = vpop.permute.xlu0 %1052 }
 0x3ff   :  { %v1473_v59 = vpop.f32.mrf.mxu1 }
 0x400   :  { %v1031_v28 = vadd.f32 %v1473_v59, %v1758_v26  ;;  %v1027_v26 = vadd.f32 %v1467_v55, %v1746_v22  ;;  %v1024_v22 = vadd.f32 %v977_v32, %v1739_v19  ;;  %v1021_v19 = vadd.f32 %v2192_v46, %v1737_v18 }
 0x401   :  { %v1007_v40 = vpop.f32.mrf.mxu1  ;;  %v1018_v18 = vadd.f32 %v2190_v51, %v1734_v17  ;;  %v1041_v17 = vld [vmem:[#allocation2 + $0x88] sm:$0xff] }
 0x402   :  { %v1030_v49 = vadd.f32 %v1007_v40, %v1781_v36  ;;  %1316 = vmatpush3.msra.mxu0 %v1031_v28  ;;  %1490 = vmatpush3.msra.mxu1 %v1031_v28  ;;  %v1063_v36 = vpop.permute.xlu1 %1062  ;;  %v1049_v15 = vpop.permute.xlu0 %1048 }
 0x403   :  { %1317 = vmatprep.subr.mxu0 %v1077_v4  ;;  %1475 = vmatprep.subr.mxu1 %v1077_v4 }
 0x404   :  { %1318 = vmatpush3.msra.mxu0 %v1030_v49  ;;  %1491 = vmatpush3.msra.mxu1 %v1030_v49 }
 0x405   :  { %1319 = vmatprep.subr.mxu0 %v1075_v38  ;;  %1476 = vmatprep.subr.mxu1 %v1075_v38 }
 0x406   :  { %1320 = vmatpush3.msra.mxu0 %v1029_v57  ;;  %1492 = vmatpush3.msra.mxu1 %v1029_v57  ;;  %v1059_v54 = vpop.permute.xlu1 %1058 }
 0x407   :  { %1321 = vmatprep.subr.mxu0 %v1073_v39  ;;  %1477 = vmatprep.subr.mxu1 %v1073_v39 }
 0x408   :  { %1322 = vmatpush3.msra.mxu0 %v1028_v45  ;;  %1493 = vmatpush3.msra.mxu1 %v1028_v45 }
 0x409   :  { %1323 = vmatprep.subr.mxu0 %v1071_v37  ;;  %1478 = vmatprep.subr.mxu1 %v1071_v37 }
 0x40a   :  { %1324 = vmatpush3.msra.mxu0 %v1027_v26  ;;  %1494 = vmatpush3.msra.mxu1 %v1027_v26  ;;  %v1055_v63 = vpop.permute.xlu1 %1054 }
 0x40b   :  { %1325 = vmatprep.subr.mxu0 %v1069_v62  ;;  %1479 = vmatprep.subr.mxu1 %v1069_v62 }
 0x40c   :  { %1326 = vmatpush3.msra.mxu0 %v1026_v24  ;;  %1495 = vmatpush3.msra.mxu1 %v1026_v24 }
 0x40d   :  { %1327 = vmatprep.subr.mxu0 %v1067_v52  ;;  %1480 = vmatprep.subr.mxu1 %v1067_v52 }
 0x40e   :  { %1328 = vmatpush3.msra.mxu0 %v1025_v25  ;;  %1496 = vmatpush3.msra.mxu1 %v1025_v25  ;;  %v1051_v20 = vpop.permute.xlu1 %1050 }
 0x40f   :  { %1329 = vmatprep.subr.mxu0 %v1065_v8  ;;  %1481 = vmatprep.subr.mxu1 %v1065_v8 }
 0x410   :  { %1330 = vmatpush3.msra.mxu0 %v1024_v22  ;;  %1497 = vmatpush3.msra.mxu1 %v1024_v22 }
 0x411   :  { %1331 = vmatprep.subr.mxu0 %v1063_v36  ;;  %1482 = vmatprep.subr.mxu1 %v1063_v36 }
 0x412   :  { %1332 = vmatpush3.msra.mxu0 %v1023_v23  ;;  %1498 = vmatpush3.msra.mxu1 %v1023_v23 }
 0x413   :  { %1333 = vmatprep.subr.mxu0 %v1061_v47  ;;  %1483 = vmatprep.subr.mxu1 %v1061_v47 }
 0x414   :  { %1334 = vmatpush3.msra.mxu0 %v1022_v16  ;;  %1499 = vmatpush3.msra.mxu1 %v1022_v16 }
 0x415   :  { %1335 = vmatprep.subr.mxu0 %v1059_v54  ;;  %1484 = vmatprep.subr.mxu1 %v1059_v54 }
 0x416   :  { %1336 = vmatpush3.msra.mxu0 %v1021_v19  ;;  %1500 = vmatpush3.msra.mxu1 %v1021_v19 }
 0x417   :  { %1337 = vmatprep.subr.mxu0 %v1057_v43  ;;  %1485 = vmatprep.subr.mxu1 %v1057_v43 }
 0x418   :  { %1338 = vmatpush3.msra.mxu0 %v1020_v21  ;;  %1501 = vmatpush3.msra.mxu1 %v1020_v21 }
 0x419   :  { %1339 = vmatprep.subr.mxu0 %v1055_v63  ;;  %1486 = vmatprep.subr.mxu1 %v1055_v63 }
 0x41a   :  { %1340 = vmatpush3.msra.mxu0 %v1019_v48  ;;  %1502 = vmatpush3.msra.mxu1 %v1019_v48 }
 0x41b   :  { %1341 = vmatprep.subr.mxu0 %v1053_v27  ;;  %1487 = vmatprep.subr.mxu1 %v1053_v27 }
 0x41c   :  { %1342 = vmatpush3.msra.mxu0 %v1018_v18  ;;  %1503 = vmatpush3.msra.mxu1 %v1018_v18 }
 0x41d   :  { %1343 = vmatprep.subr.mxu0 %v1051_v20  ;;  %1488 = vmatprep.subr.mxu1 %v1051_v20 }
 0x41e   :  { %1344 = vmatpush3.msra.mxu0 %v1017_v61  ;;  %1504 = vmatpush3.msra.mxu1 %v1017_v61 }
 0x41f   :  { %1345 = vmatprep.subr.mxu0 %v1049_v15  ;;  %1489 = vmatprep.subr.mxu1 %v1049_v15 }
 0x420   :  { %1346 = vmatpush3.msra.mxu0 %v1016_v53  ;;  %1505 = vmatpush3.msra.mxu1 %v1016_v53 }
 0x421   :  { %1161 = vmatmul.mubr.f32.vlgmr.msra.gmra.mxu0 %v2159_v34  ;;  %1181 = vmatmul.mubr.f32.vlgmr.msra.gmra.mxu1 %v2175_v29 }
 0x422   :  { %1165 = vmatprep.mubr.f32.mxu0 %v1041_v17  ;;  %1185 = vmatprep.mubr.f32.mxu1 %v1045_v31 }
 0x425   :  { %1166 = vmatmul.mubr.f32.gmra.mxu0 %v2156_v6  ;;  %1186 = vmatmul.mubr.f32.gmra.mxu1 %v2173_v9 }
 0x426   :  { %1170 = vmatprep.mubr.f32.mxu0 %v1042_v13  ;;  %1190 = vmatprep.mubr.f32.mxu1 %v1046_v2 }
 0x429   :  { %1171 = vmatmul.mubr.f32.gmra.mxu0 %v2167_v1  ;;  %1191 = vmatmul.mubr.f32.gmra.mxu1 %v2182_v10 }
 0x42a   :  { %1175 = vmatprep.mubr.f32.mxu0 %v1043_v14  ;;  %1195 = vmatprep.mubr.f32.mxu1 %v1047_v33 }
 0x42d   :  { %1176 = vmatmul.mubr.f32.gmra.mxu0 %v2165_v5  ;;  %1196 = vmatmul.mubr.f32.gmra.mxu1 %v2180_v42 }
 0x4e1   :  { %v1347_v34 = vpop.f32.mrf.mxu0  ;;  %v1359_v29 = vpop.f32.mrf.mxu1 }
 0x4e3   :  { %v1348_v60 = vpop.f32.mrf.mxu0  ;;  %v1360_v6 = vpop.f32.mrf.mxu1 }
 0x4e4   :  { %v1349_v9 = vadd.f32 %v1348_v60, %v1347_v34  ;;  %v1361_v41 = vadd.f32 %v1360_v6, %v1359_v29 }
 0x4e5   :  { %v1350_v35 = vpop.f32.mrf.mxu0  ;;  %v1362_v0 = vpop.f32.mrf.mxu1 }
 0x4e6   :  { %1202 = vst.msk [vmem:[%s2261_s3] sm:$0xff] %vm1201_vm2, %v1349_v9  ;;  %1206 = vst.msk [vmem:[%s2261_s3 + $0x20] sm:$0xff] %vm1201_vm2, %v1361_v41 }
 0x4e7   :  { %v1351_v5 = vpop.f32.mrf.mxu0  ;;  %v1363_v1 = vpop.f32.mrf.mxu1 }
 0x4e8   :  { %v1352_v42 = vadd.f32 %v1351_v5, %v1350_v35  ;;  %v1364_v10 = vadd.f32 %v1363_v1, %v1362_v0 }
 0x4e9   :  { %v1353_v11 = vpop.f32.mrf.mxu0  ;;  %v1365_v58 = vpop.f32.mrf.mxu1 }
 0x4ea   :  { %1203 = vst.msk [vmem:[%s2261_s3 + $0x8] sm:$0xff] %vm1201_vm2, %v1352_v42  ;;  %1207 = vst.msk [vmem:[%s2261_s3 + $0x28] sm:$0xff] %vm1201_vm2, %v1364_v10 }
 0x4eb   :  { %v1354_v51 = vpop.f32.mrf.mxu0  ;;  %v1366_v46 = vpop.f32.mrf.mxu1 }
 0x4ec   :  { %v1355_v50 = vadd.f32 %v1354_v51, %v1353_v11  ;;  %v1367_v30 = vadd.f32 %v1366_v46, %v1365_v58 }
 0x4ed   :  { %v1356_v44 = vpop.f32.mrf.mxu0  ;;  %v1368_v12 = vpop.f32.mrf.mxu1 }
 0x4ee   :  { %1204 = vst.msk [vmem:[%s2261_s3 + $0x10] sm:$0xff] %vm1201_vm2, %v1355_v50  ;;  %1208 = vst.msk [vmem:[%s2261_s3 + $0x30] sm:$0xff] %vm1201_vm2, %v1367_v30 }
 0x4ef   :  { %v1357_v4 = vpop.f32.mrf.mxu0  ;;  %v1369_v32 = vpop.f32.mrf.mxu1 }
 0x4f0   :  { %v1358_v55 = vadd.f32 %v1357_v4, %v1356_v44  ;;  %v1370_v38 = vadd.f32 %v1369_v32, %v1368_v12 }
 0x4f2   :  { %1205 = vst.msk [vmem:[%s2261_s3 + $0x18] sm:$0xff] %vm1201_vm2, %v1358_v55  ;;  %1209 = vst.msk [vmem:[%s2261_s3 + $0x38] sm:$0xff] %vm1201_vm2, %v1370_v38 }
 0x4f3   :  { %1214 = vsyncpa [#allocation3], 1 }

</bundles_post_ra>
